<compile_context>
chip_gen: v5e
topology: v5e:2x2
jax: 0.10.0
libtpu: 0.0.40
codegen_flags: <defaults>
</compile_context>

<pallas_src>
import jax
import jax.numpy as jnp
from jax.experimental import pallas as pl
from jax.experimental.pallas import tpu as pltpu


def _funk_svd_kernel(pu_ref, qi_ref, out_ref):
    # pu_ref, qi_ref: (K, TB) VMEM tiles (K on sublanes, batch on lanes).
    # out_ref: (1, TB) lane-dense output tile in the model dtype.
    prod = pu_ref[...].astype(jnp.float32) * qi_ref[...].astype(jnp.float32)
    # f32 accumulate, then cast to the model dtype inside the kernel (the
    # cast rides the VPU slot for free in this DMA-bound kernel).
    out_ref[...] = jnp.sum(prod, axis=0, keepdims=True).astype(out_ref.dtype)


def funk_svd_forward(P, Q, u, i, *, tile_b=16384):
    """Compute (P[u] * Q[i]).sum(-1) with the mul+reduce in a Pallas kernel.

    tile_b is the batch (lane) tile size. It is rounded to a multiple of 128,
    clamped to the (padded) batch, capped so the grid has >= 2 steps whenever
    the batch spans more than one minimal tile (lets the "parallel" axis use
    both TensorCores on v7x), and capped so double-buffered input blocks stay
    inside the most conservative default scoped-VMEM limit. Sweep 8192-32768
    in production.
    """
    B = u.shape[0]
    K = P.shape[1]
    out_dtype = jnp.promote_types(P.dtype, Q.dtype)

    if B == 0:  # empty batch: nothing to launch
        return jnp.zeros((0,), dtype=out_dtype)

    # ---- lane-tile selection ------------------------------------------------
    tile_b = max(128, pl.cdiv(tile_b, 128) * 128)   # multiple of 128
    b_ceil = pl.cdiv(B, 128) * 128                  # batch rounded up to lanes
    tile_b = min(tile_b, b_ceil)                    # never tile past the batch
    if b_ceil >= 256:
        # Keep >= 2 grid steps so dimension_semantics=("parallel",) can shard
        # the batch across v7x's 2 TensorCores (measured no-op on v5e/v6e).
        tile_b = min(tile_b, pl.cdiv(b_ceil // 2, 128) * 128)
    # Two double-buffered (K, tile_b) input blocks must fit the most
    # conservative default scoped-VMEM limit (16 MiB on v5e) with headroom,
    # so no explicit vmem_limit_bytes is needed on any generation.
    itemsize = max(P.dtype.itemsize, Q.dtype.itemsize)
    max_tile = (12 * 1024 * 1024) // (2 * 2 * K * itemsize)
    tile_b = min(tile_b, max(128, (max_tile // 128) * 128))

    B_pad = pl.cdiv(B, tile_b) * tile_b
    if B_pad != B:
        # Index 0 is always a valid row (n_users, n_items >= 1); the padded
        # lanes are sliced off below.
        u = jnp.pad(u, (0, B_pad - B))
        i = jnp.pad(i, (0, B_pad - B))

    # Row-gather straight into the (K, B) compute layout (K -> sublanes,
    # batch -> lanes).  allow_input_fusion below lets XLA feed this gather
    # (+transpose) directly into the Pallas input DMA instead of writing and
    # re-reading (K, B_pad) f32 intermediates through HBM.  If HLO ever shows
    # a separately materialized transpose, gather from pre-transposed tables
    # (jnp.take(P.T, u, axis=1)) instead.
    pu_t = jnp.take(P, u, axis=0).T  # (K, B_pad)
    qi_t = jnp.take(Q, i, axis=0).T  # (K, B_pad)

    out = pl.pallas_call(
        _funk_svd_kernel,
        out_shape=jax.ShapeDtypeStruct((1, B_pad), out_dtype),
        grid=(B_pad // tile_b,),
        in_specs=[
            pl.BlockSpec((K, tile_b), lambda b: (0, b)),
            pl.BlockSpec((K, tile_b), lambda b: (0, b)),
        ],
        out_specs=pl.BlockSpec((1, tile_b), lambda b: (0, b)),
        compiler_params=pltpu.CompilerParams(
            dimension_semantics=("parallel",),
            allow_input_fusion=[True, True],
        ),
    )(pu_t, qi_t)

    return out[0, :B]  # (B,), already in the promoted model dtype


if __name__ == "__main__":
    n_users, n_items, k = 100, 200, 32

    key = jax.random.PRNGKey(0)
    k_p, k_q, k_u, k_i, k_u2, k_i2 = jax.random.split(key, 6)

    # nn.init.normal_(weight, 0, 0.05)
    P = 0.05 * jax.random.normal(k_p, (n_users, k), dtype=jnp.float32)
    Q = 0.05 * jax.random.normal(k_q, (n_items, k), dtype=jnp.float32)

    # Small ragged batch (8 -> padded to 128 lanes, grid=(1,)).
    batch = 8
    u = jax.random.randint(k_u, (batch,), 0, n_users, dtype=jnp.int32)
    i = jax.random.randint(k_i, (batch,), 0, n_items, dtype=jnp.int32)
    out = jax.block_until_ready(funk_svd_forward(P, Q, u, i))
    ref = jnp.sum(P[u] * Q[i], axis=1)
    assert out.shape == (batch,)
    assert jnp.allclose(out, ref, atol=1e-6), (out, ref)

    # Larger ragged batch with a small explicit tile to exercise a multi-step
    # "parallel" grid and index padding (200 -> 256 lanes, grid=(2,)).
    batch2 = 200
    u2 = jax.random.randint(k_u2, (batch2,), 0, n_users, dtype=jnp.int32)
    i2 = jax.random.randint(k_i2, (batch2,), 0, n_items, dtype=jnp.int32)
    out2 = jax.block_until_ready(funk_svd_forward(P, Q, u2, i2, tile_b=128))
    ref2 = jnp.sum(P[u2] * Q[i2], axis=1)
    assert out2.shape == (batch2,)
    assert jnp.allclose(out2, ref2, atol=1e-6), (out2, ref2)

    # Empty-batch guard (previously a divide-by-zero in the wrapper).
    out0 = jax.block_until_ready(
        funk_svd_forward(P, Q, jnp.zeros((0,), jnp.int32), jnp.zeros((0,), jnp.int32))
    )
    assert out0.shape == (0,)

    print("KERNEL_OK")
</pallas_src>

<mosaic_0001>
module attributes {stable_mosaic.version = 11 : i64} {
  func.func @_funk_svd_kernel(%arg0: i32, %arg1: memref<32x128xf32, #tpu.memory_space<vmem>>, %arg2: memref<32x128xf32, #tpu.memory_space<vmem>>, %arg3: memref<1x128xf32, #tpu.memory_space<vmem>>) attributes {dimension_semantics = [#tpu.dimension_semantics<parallel>], iteration_bounds = array<i64: 1>, scalar_prefetch = 0 : i64, scratch_operands = 0 : i64, tpu.core_type = #tpu.core_type<tc>, window_params = [{transform_indices = @transform_0, window_bounds = array<i64: 32, 128>}, {transform_indices = @transform_1, window_bounds = array<i64: 32, 128>}, {transform_indices = @transform_2, window_bounds = array<i64: 1, 128>}]} {
    %c0 = arith.constant 0 : index
    %c0_0 = arith.constant 0 : index
    %0 = vector.load %arg1[%c0, %c0_0] : memref<32x128xf32, #tpu.memory_space<vmem>>, vector<32x128xf32>
    %c0_1 = arith.constant 0 : index
    %c0_2 = arith.constant 0 : index
    %1 = vector.load %arg2[%c0_1, %c0_2] : memref<32x128xf32, #tpu.memory_space<vmem>>, vector<32x128xf32>
    %2 = arith.mulf %0, %1 : vector<32x128xf32>
    %cst = arith.constant dense<0.000000e+00> : vector<128xf32>
    %3 = vector.multi_reduction <add>, %2, %cst [0] : vector<32x128xf32> to vector<128xf32>
    %4 = vector.shape_cast %3 : vector<128xf32> to vector<1x128xf32>
    %c0_3 = arith.constant 0 : index
    %c0_4 = arith.constant 0 : index
    %5 = vector.load %arg3[%c0_3, %c0_4] : memref<1x128xf32, #tpu.memory_space<vmem>>, vector<1x128xf32>
    tpu.vector_store %arg3[%c0_3, %c0_4], %4 {strides = array<i32>} : memref<1x128xf32, #tpu.memory_space<vmem>>, vector<1x128xf32>,
    return
  }
  func.func @transform_0(%arg0: i32) -> (i32, i32) {
    %c0_i32 = arith.constant 0 : i32
    %c0_i32_0 = arith.constant 0 : i32
    return %c0_i32, %arg0 : i32, i32
  }
  func.func @transform_1(%arg0: i32) -> (i32, i32) {
    %c0_i32 = arith.constant 0 : i32
    %c0_i32_0 = arith.constant 0 : i32
    return %c0_i32, %arg0 : i32, i32
  }
  func.func @transform_2(%arg0: i32) -> (i32, i32) {
    %c0_i32 = arith.constant 0 : i32
    %c0_i32_0 = arith.constant 0 : i32
    return %c0_i32, %arg0 : i32, i32
  }
}

</mosaic_0001>

<bundles_post_ra>
// kernel: tpu_custom_call.1
= control target key start
LH: loop header
LB: loop body
LE: loop exit
PB: predicated region body
PF: predicated region fallthrough
CT: control target
= control target key end

     0   :  { %7 = vsyncpa [#allocation3], 0  ;;  %s196_s0 = inlined_call_operand.hbm [shape: f32[32,128], index: 0, kind: input, shape index: {}]   ;;  %s197_s1 = inlined_call_operand.hbm [shape: f32[32,128], index: 1, kind: input, shape index: {}]   ;;  %s198_s2 = inlined_call_operand.hbm [shape: f32[1,128], index: 2, kind: output, shape index: {}]  }
   0x1   :  { %8 = vsyncpa [#allocation6], 0 }
   0x2   :  { %9 = vsyncpa [#allocation4], 0  ;;  %s14_s11 = sshll.u32 %s196_s0, 4  ;;  %s167_s12 = smov [#allocation2]   ;;  %s15_s11 = int_to_ptr.hbm [resolvable:$true] %s14_s11 }
   0x3   :  { %s16_s13 = sshll.u32 %s167_s12, 4  ;;  %s27_s16 = sshll.u32 %s197_s1, 4  ;;  %s17_s13 = int_to_ptr.vmem [resolvable:$true] %s16_s13  ;;  %s28_s16 = int_to_ptr.hbm [resolvable:$true] %s27_s16 }
   0x4   :  { %s168_s17 = smov 128   ;;  %s169_s18 = smov 8  }
   0x5   :  { %22 = dma.hbm_to_vmem [thread:$0]  %s15_s11, 512, %s17_s13, [#allocation3], %s168_s17, %s168_s17, %s169_s18  }
   0x6   :  { %s170_s19 = smov [#allocation5]  }
   0x7   :  { %s29_s20 = sshll.u32 %s170_s19, 4  ;;  %s30_s20 = int_to_ptr.vmem [resolvable:$true] %s29_s20 }
   0x8   :  { %35 = dma.hbm_to_vmem [thread:$0]  %s28_s16, 512, %s30_s20, [#allocation6], %s168_s17, %s168_s17, %s169_s18  }
   0x9   :  { %161 = dma.done.wait [#allocation3], 512  }
   0xa   :  { %162 = vsyncadd [#allocation3], 4294966784 }
   0xb   :  { %163 = dma.done.wait [#allocation6], 512  }
   0xc   :  { %164 = vsyncadd [#allocation6], 4294966784  ;;  %v44_v0 = vld [vmem:[#allocation2] sm:$0xff]  ;;  %v45_v1 = vld [vmem:[#allocation2 + $0x8] sm:$0xff]  ;;  %s171_s0 = smov [#allocation7]   ;;  %s73_s23 = sshll.u32 %s198_s2, 4  ;;  %s74_s23 = int_to_ptr.hbm [resolvable:$true] %s73_s23 }
   0xd   :  { %v46_v2 = vld [vmem:[#allocation2 + $0x10] sm:$0xff]  ;;  %v47_v3 = vld [vmem:[#allocation2 + $0x18] sm:$0xff]  ;;  %v48_v4 = vld [vmem:[#allocation5] sm:$0xff]  ;;  %s71_s1 = sshll.u32 %s171_s0, 4  ;;  %s72_s1 = int_to_ptr.vmem [resolvable:$true] %s71_s1 }
   0xe   :  { %v49_v5 = vld [vmem:[#allocation5 + $0x8] sm:$0xff]  ;;  %v50_v6 = vld [vmem:[#allocation5 + $0x10] sm:$0xff]  ;;  %v51_v7 = vld [vmem:[#allocation5 + $0x18] sm:$0xff]  ;;  %v52_v8 = vmul.f32 %v48_v4, %v44_v0 }
   0xf   :  { %v53_v9 = vmul.f32 %v49_v5, %v45_v1  ;;  %v54_v10 = vmul.f32 %v50_v6, %v46_v2  ;;  %v55_v11 = vmul.f32 %v51_v7, %v47_v3 }
  0x11   :  { %v56_v12 = vadd.f32 %v53_v9, %v52_v8 }
  0x13   :  { %v57_v13 = vadd.f32 %v56_v12, %v54_v10 }
  0x15   :  { %v58_v14 = vadd.f32 %v57_v13, %v55_v11 }
  0x17   :  { %v59_v15 = vrot.slane %v58_v14, 4 }
  0x19   :  { %v60_v16 = vadd.f32 %v59_v15, %v58_v14 }
  0x1b   :  { %v61_v17 = vrot.slane %v60_v16, 2 }
  0x1d   :  { %v62_v18 = vadd.f32 %v61_v17, %v60_v16 }
  0x1f   :  { %v63_v19 = vrot.slane %v62_v18, 1 }
  0x21   :  { %v64_v20 = vadd.f32 %v63_v19, %v62_v18 }
  0x23   :  { %65 = vst [vmem:[#allocation7] sm:$0x1] %v64_v20 }
  0x24   :  { %76 = dma.vmem_to_hbm [thread:$0]  %s72_s1, 16, %s74_s23, [#allocation4]  }
  0x25   :  { %165 = dma.done.wait [#allocation4], 16  }
  0x26   :  { %166 = vsyncadd [#allocation4], 4294967280 }
  0x27   :  { %81 = vsyncpa [#allocation3], 1 }
  0x28   :  { %82 = vsyncpa [#allocation6], 1 }
  0x29   :  { %83 = vsyncpa [#allocation4], 1 }

</bundles_post_ra>
